<compile_context>
chip_gen: v5e
topology: v5e:2x2
jax: 0.10.0
libtpu: 0.0.40
codegen_flags: <defaults>
</compile_context>

<pallas_src>
import math

import jax
import jax.numpy as jnp
from jax import lax
from jax.experimental import pallas as pl
from jax.experimental.pallas import tpu as pltpu


def _round_up(x, m):
    return ((x + m - 1) // m) * m


def _tpu_generation_params():
    """Returns (lane_align_for_small_dims, vmem_budget_bytes) for this TPU."""
    try:
        kind = jax.devices()[0].device_kind.lower()
    except Exception:  # pragma: no cover
        kind = ""
    old_mxu = any(t in kind for t in ("v2", "v3", "v4", "v5"))
    lane_align = 128 if old_mxu else 256          # 4x128^2 vs 2x256^2 MXU
    if "v7" in kind:
        vmem_budget = 40 * 1024 * 1024            # 64 MiB physical on v7x
    elif old_mxu or "v6" in kind:
        vmem_budget = 96 * 1024 * 1024            # 128 MiB physical
    else:
        vmem_budget = 40 * 1024 * 1024            # unknown: be conservative
    return lane_align, vmem_budget


def _patch_embed_kernel(x_ref, w_ref, b_ref, o_ref):
    # x_ref: (TM, Kp) bf16 patch rows (pipelined over the M grid)
    # w_ref: (Kp, Ep) bf16 weight    (grid-invariant -> resident in VMEM)
    # b_ref: (1, Ep)  f32 bias       (grid-invariant)
    # o_ref: (TM, Ep) output tile
    acc = jnp.dot(x_ref[...], w_ref[...], preferred_element_type=jnp.float32)
    o_ref[...] = (acc + b_ref[...]).astype(o_ref.dtype)


def patch_embed_forward(x, weight, bias, patch_size, *,
                        compute_dtype=jnp.bfloat16, out_dtype=None,
                        tm_max=2048):
    """x: (B, C, H, W); weight: (E, C, P, P) [PyTorch OIHW]; bias: (E,).

    Returns (B, num_patches, embed_dim) == proj(x).flatten(2).transpose(1, 2),
    in `out_dtype` (defaults to the bf16 compute dtype per the perf review;
    pass jnp.float32 for the module's original output dtype).
    """
    B, C, H, W = x.shape
    P = patch_size
    assert H % P == 0 and W % P == 0
    nH, nW = H // P, W // P
    E = weight.shape[0]
    K = C * P * P
    M = B * nH * nW

    out_dtype = compute_dtype if out_dtype is None else out_dtype
    lane_align, vmem_budget = _tpu_generation_params()

    # Patchify (pure layout work; flatten order (c, ph, pw) matches OIHW).
    # Cast first so the materialized intermediate (if XLA does not fuse it all
    # into the pallas_call prologue) is bf16 rather than f32.
    patches = (
        x.astype(compute_dtype)
        .reshape(B, C, nH, P, nW, P)
        .transpose(0, 2, 4, 1, 3, 5)          # (B, nH, nW, C, P, P)
        .reshape(M, K)
    )
    w_mat = weight.reshape(E, K).T.astype(compute_dtype)   # (K, E)
    b_mat = bias.reshape(1, E).astype(jnp.float32)

    # Pad contraction / lane dims: small dims go to a full MXU pass width
    # (256 on v6e/v7x, 128 on v4/v5); larger dims only need 128 alignment.
    # No-op for real ViT shapes (K = E = 768).
    def _pad_dim(d):
        return _round_up(d, lane_align) if d < lane_align else _round_up(d, 128)

    Kp = _pad_dim(K)
    Ep = _pad_dim(E)
    if Kp != K:
        patches = jnp.pad(patches, ((0, 0), (0, Kp - K)))
        w_mat = jnp.pad(w_mat, ((0, Kp - K), (0, 0)))
    if Ep != E:
        w_mat = jnp.pad(w_mat, ((0, 0), (0, Ep - E)))
        b_mat = jnp.pad(b_mat, ((0, 0), (0, Ep - E)))

    # Derive the M tile from the VMEM budget: double-buffered input/output
    # tiles plus the resident (double-buffered) weight and bias.
    in_itemsize = jnp.dtype(compute_dtype).itemsize
    out_itemsize = jnp.dtype(out_dtype).itemsize
    resident_bytes = 2 * (Kp * Ep * in_itemsize + Ep * 4)
    per_row_bytes = 2 * (Kp * in_itemsize + Ep * out_itemsize)
    avail = max(vmem_budget - resident_bytes - (4 << 20), per_row_bytes)
    tm_cap = min(tm_max, avail // per_row_bytes)
    if tm_cap >= 256:
        tm_cap = (tm_cap // 256) * 256
    else:
        tm_cap = max(16, (tm_cap // 16) * 16)

    if M > tm_cap:
        # Balance block sizes to minimize M padding; >= 2 grid steps here.
        nblk = -(-M // tm_cap)
        TM = _round_up(-(-M // nblk), 16)
        Mp = _round_up(M, TM)
    elif M > 16:
        # Small-M path: 16-row alignment (bf16 sublane packing) and >= 2 grid
        # steps so both v7x TensorCores get work.
        Mp = _round_up(M, 32)
        TM = Mp // 2
    else:
        Mp = _round_up(M, 16)
        TM = Mp
    if Mp != M:
        patches = jnp.pad(patches, ((0, Mp - M), (0, 0)))

    grid = (Mp // TM,)

    cost = pl.CostEstimate(
        flops=2 * Mp * Kp * Ep,
        transcendentals=0,
        bytes_accessed=(Mp * Kp * in_itemsize + Kp * Ep * in_itemsize
                        + Ep * 4 + Mp * Ep * out_itemsize),
    )

    out = pl.pallas_call(
        _patch_embed_kernel,
        out_shape=jax.ShapeDtypeStruct((Mp, Ep), out_dtype),
        grid_spec=pl.GridSpec(
            grid=grid,
            in_specs=[
                pl.BlockSpec((TM, Kp), lambda i: (i, 0)),
                pl.BlockSpec((Kp, Ep), lambda i: (0, 0)),   # resident weight
                pl.BlockSpec((1, Ep), lambda i: (0, 0)),    # resident bias
            ],
            out_specs=pl.BlockSpec((TM, Ep), lambda i: (i, 0)),
        ),
        compiler_params=pltpu.CompilerParams(
            dimension_semantics=("parallel",),
            vmem_limit_bytes=vmem_budget,
            allow_input_fusion=[True, True, True],
        ),
        cost_estimate=cost,
    )(patches, w_mat, b_mat)

    if Mp != M or Ep != E:
        out = out[:M, :E]
    # (B, num_patches, embed_dim) == proj(x).flatten(2).transpose(1, 2)
    return out.reshape(B, nH * nW, E)


if __name__ == "__main__":
    # Small shapes consistent with the module: img_size=16, patch_size=4,
    # in_chans=4, embed_dim=32, batch=2.
    B, C, H, W = 2, 4, 16, 16
    P = 4
    E = 32

    key = jax.random.PRNGKey(0)
    kx, kw = jax.random.split(key)

    x = jax.random.normal(kx, (B, C, H, W), dtype=jnp.float32)

    # Deterministic init matching PatchEmbed.init_weights:
    # uniform(-val, val) with val = sqrt(6 / (3 * P * P + E)), bias zeros.
    val = math.sqrt(6.0 / float(3 * P * P + E))
    weight = jax.random.uniform(
        kw, (E, C, P, P), minval=-val, maxval=val, dtype=jnp.float32
    )
    bias = jnp.zeros((E,), dtype=jnp.float32)

    fwd = jax.jit(lambda a, w, b: patch_embed_forward(a, w, b, P))
    out = jax.block_until_ready(fwd(x, weight, bias))

    # Reference: actual strided conv (NCHW, OIHW) -> flatten(2).transpose(1,2).
    # The kernel feeds the MXU in bf16 (f32 accumulate) and emits bf16 output
    # by default, so compare against the conv on bf16-rounded inputs with a
    # bf16-output tolerance.
    x_bf = x.astype(jnp.bfloat16).astype(jnp.float32)
    w_bf = weight.astype(jnp.bfloat16).astype(jnp.float32)
    ref = lax.conv_general_dilated(
        x_bf, w_bf, window_strides=(P, P), padding="VALID",
        dimension_numbers=("NCHW", "OIHW", "NCHW"),
        precision=lax.Precision.HIGHEST,
    )
    ref = ref.reshape(B, E, -1).transpose(0, 2, 1) + bias.reshape(1, 1, E)

    assert out.shape == (B, (H // P) * (W // P), E), out.shape
    out_f32 = out.astype(jnp.float32)
    err = float(jnp.max(jnp.abs(out_f32 - ref)))
    assert jnp.allclose(out_f32, ref, atol=3e-2, rtol=3e-2), err
    print("KERNEL_OK")
</pallas_src>

<mosaic_0001>
module attributes {stable_mosaic.version = 11 : i64} {
  func.func @_patch_embed_kernel(%arg0: i32, %arg1: memref<16x256xbf16, #tpu.memory_space<vmem>>, %arg2: memref<256x256xbf16, #tpu.memory_space<vmem>>, %arg3: memref<1x256xf32, #tpu.memory_space<vmem>>, %arg4: memref<16x256xbf16, #tpu.memory_space<vmem>>) attributes {dimension_semantics = [#tpu.dimension_semantics<parallel>], iteration_bounds = array<i64: 2>, scalar_prefetch = 0 : i64, scratch_operands = 0 : i64, tpu.core_type = #tpu.core_type<tc>, window_params = [{transform_indices = @transform_0, window_bounds = array<i64: 16, 256>}, {pipeline_mode = #tpu.pipeline_mode<synchronous>, transform_indices = @transform_1, window_bounds = array<i64: 256, 256>}, {pipeline_mode = #tpu.pipeline_mode<synchronous>, transform_indices = @transform_2, window_bounds = array<i64: 1, 256>}, {transform_indices = @transform_3, window_bounds = array<i64: 16, 256>}]} {
    %c0 = arith.constant 0 : index
    %c0_0 = arith.constant 0 : index
    %0 = vector.load %arg1[%c0, %c0_0] : memref<16x256xbf16, #tpu.memory_space<vmem>>, vector<16x256xbf16>
    %c0_1 = arith.constant 0 : index
    %c0_2 = arith.constant 0 : index
    %1 = vector.load %arg2[%c0_1, %c0_2] : memref<256x256xbf16, #tpu.memory_space<vmem>>, vector<256x256xbf16>
    %cst = arith.constant dense<0.000000e+00> : vector<16x256xf32>
    %2 = tpu.matmul %0, %1, %cst {dimension_numbers = #tpu.dot_dimension_numbers<[1], [0], [0], [1], [0, 0, 1, 1], [], []>} : vector<16x256xbf16>, vector<256x256xbf16>, vector<16x256xf32> -> vector<16x256xf32>
    %c0_3 = arith.constant 0 : index
    %c0_4 = arith.constant 0 : index
    %3 = vector.load %arg3[%c0_3, %c0_4] : memref<1x256xf32, #tpu.memory_space<vmem>>, vector<1x256xf32>
    %4 = vector.broadcast %3 : vector<1x256xf32> to vector<16x256xf32>
    %5 = arith.addf %2, %4 : vector<16x256xf32>
    %6 = arith.truncf %5 : vector<16x256xf32> to vector<16x256xbf16>
    %c0_5 = arith.constant 0 : index
    %c0_6 = arith.constant 0 : index
    %7 = vector.load %arg4[%c0_5, %c0_6] : memref<16x256xbf16, #tpu.memory_space<vmem>>, vector<16x256xbf16>
    tpu.vector_store %arg4[%c0_5, %c0_6], %6 {strides = array<i32>} : memref<16x256xbf16, #tpu.memory_space<vmem>>, vector<16x256xbf16>,
    return
  }
  func.func @transform_0(%arg0: i32) -> (i32, i32) {
    %c0_i32 = arith.constant 0 : i32
    %c0_i32_0 = arith.constant 0 : i32
    return %arg0, %c0_i32 : i32, i32
  }
  func.func @transform_1(%arg0: i32) -> (i32, i32) {
    %c0_i32 = arith.constant 0 : i32
    %c0_i32_0 = arith.constant 0 : i32
    %c0_i32_1 = arith.constant 0 : i32
    return %c0_i32, %c0_i32_0 : i32, i32
  }
  func.func @transform_2(%arg0: i32) -> (i32, i32) {
    %c0_i32 = arith.constant 0 : i32
    %c0_i32_0 = arith.constant 0 : i32
    %c0_i32_1 = arith.constant 0 : i32
    return %c0_i32, %c0_i32_0 : i32, i32
  }
  func.func @transform_3(%arg0: i32) -> (i32, i32) {
    %c0_i32 = arith.constant 0 : i32
    %c0_i32_0 = arith.constant 0 : i32
    return %arg0, %c0_i32 : i32, i32
  }
}

</mosaic_0001>

<bundles_post_ra>
// kernel: _lambda_.2
= control target key start
LH: loop header
LB: loop body
LE: loop exit
PB: predicated region body
PF: predicated region fallthrough
CT: control target
= control target key end

     0   :  { %s1468_s22 = smov 0   ;;  %s1583_s0 = inlined_call_operand.vmem [shape: bf16[64,32], index: 0, kind: input, shape index: {}]   ;;  %s1584_s1 = inlined_call_operand.<no memory space> [shape: bf16[], index: 1, kind: input, shape index: {}]   ;;  %s1585_s2 = inlined_call_operand.vmem [shape: bf16[32,64], index: 2, kind: input, shape index: {}]   ;;  %s1586_s3 = inlined_call_operand.vmem [shape: f32[1,32], index: 3, kind: input, shape index: {}]   ;;  %s1587_s4 = inlined_call_operand.<no memory space> [shape: f32[], index: 4, kind: input, shape index: {}]   ;;  %s1588_s5 = inlined_call_operand.vmem [shape: bf16[32,256], index: 5, kind: output, shape index: {}]  }
   0x1   :  { %v10_v0 = vstv %s1584_s1  ;;  %v1464_v1 = vstv %s1587_s4 }
   0x2   :  { %v1466_v2 = vunpack.i.l.bf16 %v10_v0 }
   0x3 LB: > { %s1051_s23 = sadd.s32 4294967295, %s1426_s22   ;;  %p1055_p0 = scmp.ge.s32.totalorder %s1426_s22, 1  ;;  %s1426_s22 = sphi %s1468_s22, %s26_s22  }
   0x4   : > { %p151_p1 = scmp.lt.s32.totalorder %s1426_s22, 3 }
   0x6   : > { %p152_p2 = pnand %p1055_p0, %p151_p1 }
   0x8   : > { %155 = sbr.rel (%p152_p2) target bundleno = 224 (0xe0), region = 32 }
   0xd   : > { %v1478_v3 = vpack.c.bf16 %v1466_v2, %v1466_v2  ;;  %722 = vst [vmem:[#allocation19 + $0x1] sm:$0x1] %v1464_v1  ;;  %s1056_s1 = sshll.u32 %s1051_s23, 1  ;;  %v201_v4 = vlaneseq  ;;  %v1067_v12 = vld [vmem:[%s1583_s0 + $0x18] sm:$0xff]   ;;  %v1065_v19 = vld [vmem:[%s1583_s0 + $0x10] sm:$0xff]   ;;  %v1063_v24 = vld [vmem:[%s1583_s0 + $0x8] sm:$0xff]  }
   0xe   : > { %p177_p3 = scmp.lt.s32.totalorder %s1056_s1, 3  ;;  %v420_v17 = vunpack.c.l.bf16 %v1067_v12  ;;  %v448_v18 = vunpack.c.h.bf16 %v1067_v12  ;;  %v364_v27 = vunpack.c.l.bf16 %v1065_v19  ;;  %v392_v30 = vunpack.c.h.bf16 %v1065_v19  ;;  %v252_v43 = vld [vmem:[%s1583_s0] sm:$0xff]  }
   0xf   : > { %1326 = vst [vmem:[#allocation18 + $0x70] sm:$0xff] %v1478_v3   ;;  %v1492_v11 = vand.u32 127, %v201_v4  ;;  %v308_v35 = vunpack.c.l.bf16 %v1063_v24  ;;  %v336_v38 = vunpack.c.h.bf16 %v1063_v24  ;;  %v253_v50 = vunpack.c.l.bf16 %v252_v43 }
  0x10   : > { %1331 = vst [vmem:[#allocation18 + $0x78] sm:$0xff] %v1478_v3   ;;  %s1590_s1 = smov (!%p177_p3, %s1056_s1), 3  ;;  %v280_v52 = vunpack.c.h.bf16 %v252_v43 }
  0x11   : > { %1296 = vst [vmem:[#allocation18 + $0x40] sm:$0xff] %v1478_v3   ;;  %vm258_vm0 = vcmp.lt.s32.totalorder %v1492_v11, 32  ;;  %s1057_s29 = sshll.u32 %s1590_s1, 2  ;;  %vm204_vm1 = vcmp.lt.s32.totalorder %v1492_v11, 64  ;;  %s1207_s12 = sshll.u32 %s1590_s1, 3 }
  0x12   : > { %1301 = vst [vmem:[#allocation18 + $0x48] sm:$0xff] %v1478_v3   ;;  %v426_v28 = vsel %vm258_vm0, %v420_v17, %v1466_v2  ;;  %v454_v29 = vsel %vm258_vm0, %v448_v18, %v1466_v2  ;;  %v370_v39 = vsel %vm258_vm0, %v364_v27, %v1466_v2  ;;  %v398_v42 = vsel %vm258_vm0, %v392_v30, %v1466_v2  ;;  %s180_s9 = scalar_lea.vmem %s1585_s2, %s1057_s29  ;;  %s187_s15 = scalar_lea.vmem %s1588_s5, %s1207_s12 }
  0x13   : > { %1306 = vst [vmem:[#allocation18 + $0x50] sm:$0xff] %v1478_v3   ;;  %v1285_v40 = vpack.c.bf16 %v1466_v2, %v426_v28  ;;  %v1290_v41 = vpack.c.bf16 %v1466_v2, %v454_v29  ;;  %v314_v46 = vsel %vm258_vm0, %v308_v35, %v1466_v2  ;;  %v1275_v47 = vpack.c.bf16 %v1466_v2, %v370_v39  ;;  %v198_v53 = vld [vmem:[%s180_s9] sm:$0xff]  }
  0x14   : > { %1311 = vst [vmem:[#allocation18 + $0x58] sm:$0xff] %v1478_v3   ;;  %v342_v48 = vsel %vm258_vm0, %v336_v38, %v1466_v2  ;;  %v1280_v49 = vpack.c.bf16 %v1466_v2, %v398_v42  ;;  %v1265_v51 = vpack.c.bf16 %v1466_v2, %v314_v46  ;;  %v259_v56 = vsel %vm258_vm0, %v253_v50, %v1466_v2 }
  0x15   : > { %1316 = vst [vmem:[#allocation18 + $0x60] sm:$0xff] %v1478_v3   ;;  %v1270_v54 = vpack.c.bf16 %v1466_v2, %v342_v48  ;;  %v199_v57 = vunpack.c.l.bf16 %v198_v53  ;;  %v286_v60 = vsel %vm258_vm0, %v280_v52, %v1466_v2  ;;  %v226_v61 = vunpack.c.h.bf16 %v198_v53 }
  0x16   : > { %v1135_v5 = vld [vmem:[#allocation18 + $0x70] sm:$0xf]  ;;  %1321 = vst [vmem:[#allocation18 + $0x68] sm:$0xff] %v1478_v3   ;;  %v1224_v6 = vld [vmem:[#allocation18 + $0x74] sm:$0xf]  ;;  %v1260_v12 = vpack.c.bf16 %v1466_v2, %v286_v60  ;;  %v707_v30 = vshrl.u32 %v201_v4, 7 }
  0x17   : > { %v1225_v7 = vld [vmem:[#allocation18 + $0x74] sm:$0xf0]  ;;  %1336 = vst [vmem:[#allocation18 + $0x80] sm:$0xff] %v1478_v3   ;;  %v1137_v8 = vld [vmem:[#allocation18 + $0x78] sm:$0xf0] }
  0x18   : > { %v1136_v9 = vor.u32 %v1225_v7, %v1135_v5  ;;  %1341 = vst [vmem:[#allocation18 + $0x88] sm:$0xff] %v1478_v3   ;;  %v1140_v10 = vor.u32 %v1224_v6, %v1137_v8  ;;  %v1111_v33 = vld [vmem:[#allocation18 + $0x40] sm:$0xf]  ;;  %v1218_v36 = vld [vmem:[#allocation18 + $0x44] sm:$0xf]  ;;  %v1255_v6 = vpack.c.bf16 %v1466_v2, %v259_v56  ;;  %vm709_vm2 = vcmp.lt.s32.totalorder %v707_v30, 1 }
  0x19   : > { %1346 = vst [vmem:[#allocation18 + $0x90] sm:$0xff] %v1478_v3   ;;  %v1219_v34 = vld [vmem:[#allocation18 + $0x44] sm:$0xf0]  ;;  %v1113_v37 = vld [vmem:[#allocation18 + $0x48] sm:$0xf0] }
  0x1a   : > { %933 = vmatpush.bf16.msra.mxu0 %v1136_v9  ;;  %1351 = vst [vmem:[#allocation18 + $0x98] sm:$0xff] %v1478_v3   ;;  %961 = vmatpush.bf16.msra.mxu2 %v1140_v10  ;;  %v1119_v13 = vld [vmem:[#allocation18 + $0x50] sm:$0xf]  ;;  %v1220_v15 = vld [vmem:[#allocation18 + $0x54] sm:$0xf]  ;;  %v1112_v44 = vor.u32 %v1219_v34, %v1111_v33  ;;  %v1116_v45 = vor.u32 %v1218_v36, %v1113_v37 }
  0x1b   : > { %1356 = vst [vmem:[#allocation18 + $0xa0] sm:$0xff] %v1478_v3   ;;  %v1221_v14 = vld [vmem:[#allocation18 + $0x54] sm:$0xf0]  ;;  %v1121_v16 = vld [vmem:[#allocation18 + $0x58] sm:$0xf0] }
  0x1c   : > { %1361 = vst [vmem:[#allocation18 + $0xa8] sm:$0xff] %v1478_v3   ;;  %v1127_v20 = vld [vmem:[#allocation18 + $0x60] sm:$0xf]  ;;  %v1222_v21 = vld [vmem:[#allocation18 + $0x64] sm:$0xf]  ;;  %v1120_v31 = vor.u32 %v1221_v14, %v1119_v13  ;;  %v1124_v32 = vor.u32 %v1220_v15, %v1121_v16  ;;  %v205_v13 = vsel %vm204_vm1, %v199_v57, %v1466_v2 }
  0x1d   : > { %1366 = vst [vmem:[#allocation18 + $0xb0] sm:$0xff] %v1478_v3   ;;  %v1223_v22 = vld [vmem:[#allocation18 + $0x64] sm:$0xf0]  ;;  %v1129_v23 = vld [vmem:[#allocation18 + $0x68] sm:$0xf0]  ;;  %v1245_v29 = vpack.c.bf16 %v1466_v2, %v205_v13 }
  0x1e   : > { %1371 = vst [vmem:[#allocation18 + $0xb8] sm:$0xff] %v1478_v3   ;;  %v1128_v25 = vor.u32 %v1223_v22, %v1127_v20  ;;  %v1132_v26 = vor.u32 %v1222_v21, %v1129_v23  ;;  %v232_v20 = vsel %vm204_vm1, %v226_v61, %v1466_v2  ;;  %v705_v4 = vld [vmem:[%s1586_s3] sm:$0x1] }
  0x1f   : > { %1376 = vst [vmem:[#allocation18 + $0xc0] sm:$0xff] %v1478_v3   ;;  %v1250_v34 = vpack.c.bf16 %v1466_v2, %v232_v20  ;;  %v710_v46 = vsel %vm709_vm2, %v705_v4, %v1464_v1 }
  0x20   : > { %1381 = vst [vmem:[#allocation18 + $0xc8] sm:$0xff] %v1478_v3   ;;  %934 = vmatpush.bf16.msra.mxu0 %v1128_v25  ;;  %962 = vmatpush.bf16.msra.mxu2 %v1132_v26  ;;  %v715_v50 = vsel %vm258_vm0, %v710_v46, %v1464_v1 }
  0x21   : > { %1386 = vst [vmem:[#allocation18 + $0xd0] sm:$0xff] %v1478_v3   ;;  %v1153_v13 = vld [vmem:[#allocation18 + $0x98] sm:$0xf0] }
  0x22   : > { %1391 = vst [vmem:[#allocation18 + $0xd8] sm:$0xff] %v1478_v3   ;;  %v1159_v11 = vld [vmem:[#allocation18 + $0xa0] sm:$0xf] }
  0x23   : > { %1396 = vst [vmem:[#allocation18 + $0xe0] sm:$0xff] %v1478_v3  }
  0x24   : > { %1401 = vst [vmem:[#allocation18 + $0xe8] sm:$0xff] %v1478_v3   ;;  %935 = vmatpush.bf16.msra.mxu0 %v1120_v31  ;;  %963 = vmatpush.bf16.msra.mxu2 %v1124_v32 }
  0x25   : > { %1406 = vst [vmem:[#allocation18 + $0xf0] sm:$0xff] %v1478_v3   ;;  %v1233_v48 = vld [vmem:[#allocation18 + $0xb4] sm:$0xf0] }
  0x26   : > { %1411 = vst [vmem:[#allocation18 + $0xf8] sm:$0xff] %v1478_v3   ;;  %v1234_v42 = vld [vmem:[#allocation18 + $0xc4] sm:$0xf] }
  0x27   : > { %1286 = vst [vmem:[#allocation18 + $0x30] sm:$0xff] %v1285_v40   ;;  %v1175_v40 = vld [vmem:[#allocation18 + $0xc0] sm:$0xf]  ;;  %v1177_v43 = vld [vmem:[#allocation18 + $0xc8] sm:$0xf0] }
  0x28   : > { %936 = vmatpush.bf16.msra.mxu0 %v1112_v44  ;;  %964 = vmatpush.bf16.msra.mxu2 %v1116_v45  ;;  %1291 = vst [vmem:[#allocation18 + $0x38] sm:$0xff] %v1290_v41   ;;  %v1183_v15 = vld [vmem:[#allocation18 + $0xd0] sm:$0xf]  ;;  %v1236_v17 = vld [vmem:[#allocation18 + $0xd4] sm:$0xf]  ;;  %v1180_v52 = vor.u32 %v1234_v42, %v1177_v43 }
  0x29   : > { %1276 = vst [vmem:[#allocation18 + $0x20] sm:$0xff] %v1275_v47   ;;  %v1237_v16 = vld [vmem:[#allocation18 + $0xd4] sm:$0xf0]  ;;  %v1185_v22 = vld [vmem:[#allocation18 + $0xd8] sm:$0xf0] }
  0x2a   : > { %v1191_v55 = vld [vmem:[#allocation18 + $0xe0] sm:$0xf]  ;;  %1281 = vst [vmem:[#allocation18 + $0x28] sm:$0xff] %v1280_v49   ;;  %v1238_v59 = vld [vmem:[#allocation18 + $0xe4] sm:$0xf]  ;;  %v1184_v38 = vor.u32 %v1237_v16, %v1183_v15  ;;  %v1188_v39 = vor.u32 %v1236_v17, %v1185_v22 }
  0x2b   : > { %v1239_v58 = vld [vmem:[#allocation18 + $0xe4] sm:$0xf0]  ;;  %1266 = vst [vmem:[#allocation18 + $0x10] sm:$0xff] %v1265_v51   ;;  %v1193_v5 = vld [vmem:[#allocation18 + $0xe8] sm:$0xf0] }
  0x2c   : > { %v1199_v62 = vld [vmem:[#allocation18 + $0xf0] sm:$0xf]  ;;  %v1240_v63 = vld [vmem:[#allocation18 + $0xf4] sm:$0xf]  ;;  %1271 = vst [vmem:[#allocation18 + $0x18] sm:$0xff] %v1270_v54   ;;  %v1192_v14 = vor.u32 %v1239_v58, %v1191_v55  ;;  %v1196_v21 = vor.u32 %v1238_v59, %v1193_v5 }
  0x2d   : > { %v1241_v0 = vld [vmem:[#allocation18 + $0xf4] sm:$0xf0]  ;;  %v1201_v3 = vld [vmem:[#allocation18 + $0xf8] sm:$0xf0]  ;;  %1256 = vst [vmem:[#allocation18] sm:$0xff] %v1255_v6  }
  0x2e   : > { %v1200_v7 = vor.u32 %v1241_v0, %v1199_v62  ;;  %v1204_v8 = vor.u32 %v1240_v63, %v1201_v3  ;;  %v1103_v9 = vld [vmem:[#allocation18 + $0x30] sm:$0xf]  ;;  %v1216_v10 = vld [vmem:[#allocation18 + $0x34] sm:$0xf]  ;;  %1261 = vst [vmem:[#allocation18 + $0x8] sm:$0xff] %v1260_v12  }
  0x2f   : > { %v1217_v18 = vld [vmem:[#allocation18 + $0x34] sm:$0xf0]  ;;  %v1105_v19 = vld [vmem:[#allocation18 + $0x38] sm:$0xf0]  ;;  %v1235_v41 = vld [vmem:[#allocation18 + $0xc4] sm:$0xf0] }
  0x30   : > { %947 = vmatpush.bf16.msra.mxu1 %v1200_v7  ;;  %975 = vmatpush.bf16.msra.mxu3 %v1204_v8  ;;  %v1104_v23 = vor.u32 %v1217_v18, %v1103_v9  ;;  %v1108_v24 = vor.u32 %v1216_v10, %v1105_v19  ;;  %v1095_v25 = vld [vmem:[#allocation18 + $0x20] sm:$0xf]  ;;  %v1214_v26 = vld [vmem:[#allocation18 + $0x24] sm:$0xf]  ;;  %1246 = vst [vmem:[#allocation17] sm:$0xff] %v1245_v29  }
  0x31   : > { %v1215_v27 = vld [vmem:[#allocation18 + $0x24] sm:$0xf0]  ;;  %v1097_v28 = vld [vmem:[#allocation18 + $0x28] sm:$0xf0]  ;;  %1251 = vst [vmem:[#allocation17 + $0x8] sm:$0xff] %v1250_v34   ;;  %v1176_v51 = vor.u32 %v1235_v41, %v1175_v40 }
  0x32   : > { %937 = vmatpush.bf16.msra.mxu0 %v1104_v23  ;;  %965 = vmatpush.bf16.msra.mxu2 %v1108_v24  ;;  %v1096_v31 = vor.u32 %v1215_v27, %v1095_v25  ;;  %v1100_v32 = vor.u32 %v1214_v26, %v1097_v28  ;;  %v1087_v33 = vld [vmem:[#allocation18 + $0x10] sm:$0xf]  ;;  %v1212_v36 = vld [vmem:[#allocation18 + $0x14] sm:$0xf]  ;;  %718 = vst [vmem:[#allocation19] sm:$0x1] %v715_v50 }
  0x33   : > { %v1213_v35 = vld [vmem:[#allocation18 + $0x14] sm:$0xf0]  ;;  %v1089_v37 = vld [vmem:[#allocation18 + $0x18] sm:$0xf0]  ;;  %v1167_v47 = vld [vmem:[#allocation18 + $0xb0] sm:$0xf] }
  0x34   : > { %948 = vmatpush.bf16.msra.mxu1 %v1192_v14  ;;  %976 = vmatpush.bf16.msra.mxu3 %v1196_v21  ;;  %v1088_v44 = vor.u32 %v1213_v35, %v1087_v33  ;;  %v1092_v45 = vor.u32 %v1212_v36, %v1089_v37  ;;  %v1232_v49 = vld [vmem:[#allocation18 + $0xb4] sm:$0xf]  ;;  %v1079_v53 = vld [vmem:[#allocation18] sm:$0xf]  ;;  %v1210_v54 = vld [vmem:[#allocation18 + $0x4] sm:$0xf]  ;;  %v1168_v60 = vor.u32 %v1233_v48, %v1167_v47 }
  0x35   : > { %v1169_v55 = vld [vmem:[#allocation18 + $0xb8] sm:$0xf0]  ;;  %v1211_v56 = vld [vmem:[#allocation18 + $0x4] sm:$0xf0]  ;;  %v1081_v57 = vld [vmem:[#allocation18 + $0x8] sm:$0xf0] }
  0x36   : > { %938 = vmatpush.bf16.msra.mxu0 %v1096_v31  ;;  %966 = vmatpush.bf16.msra.mxu2 %v1100_v32  ;;  %v1080_v58 = vor.u32 %v1211_v56, %v1079_v53  ;;  %v1084_v59 = vor.u32 %v1210_v54, %v1081_v57  ;;  %v1172_v61 = vor.u32 %v1232_v49, %v1169_v55  ;;  %v1230_v62 = vld [vmem:[#allocation18 + $0xa4] sm:$0xf]  ;;  %v1231_v0 = vld [vmem:[#allocation18 + $0xa4] sm:$0xf0]  ;;  %v1161_v3 = vld [vmem:[#allocation18 + $0xa8] sm:$0xf0] }
  0x37   : > { %v1071_v63 = vld [vmem:[#allocation17] sm:$0xf]  ;;  %v1160_v7 = vor.u32 %v1231_v0, %v1159_v11  ;;  %v1164_v8 = vor.u32 %v1230_v62, %v1161_v3  ;;  %v1229_v10 = vld [vmem:[#allocation18 + $0x94] sm:$0xf0]  ;;  %v1228_v12 = vld [vmem:[#allocation18 + $0x94] sm:$0xf] }
  0x38   : > { %949 = vmatpush.bf16.msra.mxu1 %v1184_v38  ;;  %977 = vmatpush.bf16.msra.mxu3 %v1188_v39  ;;  %v1209_v5 = vld [vmem:[#allocation17 + $0x4] sm:$0xf0]  ;;  %v1151_v9 = vld [vmem:[#allocation18 + $0x90] sm:$0xf]  ;;  %v1156_v15 = vor.u32 %v1228_v12, %v1153_v13  ;;  %v1143_v16 = vld [vmem:[#allocation18 + $0x80] sm:$0xf] }
  0x39   : > { %v1072_v6 = vor.u32 %v1209_v5, %v1071_v63  ;;  %v1152_v14 = vor.u32 %v1229_v10, %v1151_v9  ;;  %v1227_v17 = vld [vmem:[#allocation18 + $0x84] sm:$0xf0]  ;;  %v1226_v18 = vld [vmem:[#allocation18 + $0x84] sm:$0xf]  ;;  %v1145_v19 = vld [vmem:[#allocation18 + $0x88] sm:$0xf0] }
  0x3a   : > { %939 = vmatpush.bf16.msra.mxu0 %v1088_v44  ;;  %967 = vmatpush.bf16.msra.mxu2 %v1092_v45  ;;  %v1144_v20 = vor.u32 %v1227_v17, %v1143_v16  ;;  %v1148_v21 = vor.u32 %v1226_v18, %v1145_v19  ;;  %v1208_v22 = vld [vmem:[#allocation17 + $0x4] sm:$0xf]  ;;  %v1073_v23 = vld [vmem:[#allocation17 + $0x8] sm:$0xf0]  ;;  %v757_v25 = vld [vmem:[#allocation19] sm:$0x3] }
  0x3b   : > { %v1076_v24 = vor.u32 %v1208_v22, %v1073_v23  ;;  %v759_v26 = vperm.slane %v757_v25, 0  ;;  %v760_v29 = vperm.slane %v757_v25, 1 }
  0x3c   : > { %950 = vmatpush.bf16.msra.mxu1 %v1176_v51  ;;  %978 = vmatpush.bf16.msra.mxu3 %v1180_v52 }
  0x3e   : > { %940 = vmatpush.bf16.msra.mxu0 %v1080_v58  ;;  %968 = vmatpush.bf16.msra.mxu2 %v1084_v59 }
  0x40   : > { %951 = vmatpush.bf16.msra.mxu1 %v1168_v60  ;;  %979 = vmatpush.bf16.msra.mxu3 %v1172_v61 }
  0x41   : > { %941 = vmatmul.bf16.vlgmr.msra.gmra.mxu0 %v1072_v6  ;;  %969 = vmatmul.bf16.vlgmr.msra.gmra.mxu2 %v1072_v6 }
  0x44   : > { %952 = vmatpush.bf16.msra.mxu1 %v1160_v7  ;;  %980 = vmatpush.bf16.msra.mxu3 %v1164_v8 }
  0x48   : > { %953 = vmatpush.bf16.msra.mxu1 %v1152_v14  ;;  %981 = vmatpush.bf16.msra.mxu3 %v1156_v15 }
  0x4c   : > { %954 = vmatpush.bf16.msra.mxu1 %v1144_v20  ;;  %982 = vmatpush.bf16.msra.mxu3 %v1148_v21 }
  0x4f   : > { %955 = vmatmul.bf16.vlgmr.msra.gmra.mxu1 %v1076_v24  ;;  %983 = vmatmul.bf16.vlgmr.msra.gmra.mxu3 %v1076_v24 }
  0xbe   : > { %v942_v27 = vpop.f32.mrf.mxu0 }
  0xbf   : > { %v943_v30 = vadd.f32 %v942_v27, %v759_v26 }
  0xc4   : > { %v970_v28 = vpop.f32.mrf.mxu2 }
  0xc5   : > { %v971_v31 = vadd.f32 %v970_v28, %v760_v29 }
  0xc6   : > { %v944_v36 = vpop.f32.mrf.mxu0 }
  0xc7   : > { %v945_v39 = vadd.f32 %v944_v36, %v759_v26 }
  0xcc   : > { %v956_v32 = vpop.f32.mrf.mxu1  ;;  %v972_v37 = vpop.f32.mrf.mxu2 }
  0xcd   : > { %v957_v33 = vadd.f32 %v956_v32, %v943_v30  ;;  %v973_v40 = vadd.f32 %v972_v37, %v760_v29 }
  0xd2   : > { %v984_v34 = vpop.f32.mrf.mxu3 }
  0xd3   : > { %v985_v35 = vadd.f32 %v984_v34, %v971_v31 }
  0xd4   : > { %v958_v41 = vpop.f32.mrf.mxu1 }
  0xd5   : > { %v989_v38 = vpack.c.bf16 %v985_v35, %v957_v33  ;;  %v959_v43 = vadd.f32 %v958_v41, %v945_v39 }
  0xd7   : > { %991 = vst [vmem:[%s187_s15] sm:$0xff] %v989_v38 }
  0xda   : > { %v986_v42 = vpop.f32.mrf.mxu3 }
  0xdb   : > { %v987_v4 = vadd.f32 %v986_v42, %v973_v40 }
  0xdd   : > { %v990_v44 = vpack.c.bf16 %v987_v4, %v959_v43 }
  0xdf   : > { %992 = vst [vmem:[%s187_s15 + $0x8] sm:$0xff] %v990_v44 }
  0xe0 PF: > { %s26_s22 = sadd.s32 1, %s1426_s22  }
  0xe1   : > { %p23_p4 = scmp.ge.s32.totalorder %s26_s22, 4  }
  0xe3   :  { %25 = sbr.rel (!%p23_p4) target bundleno = 3 (0x3), region = 137 }

</bundles_post_ra>
